<compile_context>
chip_gen: v6e
topology: v6e:2x2x1
jax: 0.10.0
libtpu: 0.0.40
codegen_flags: <defaults>
</compile_context>

<pallas_src>
import jax
import jax.numpy as jnp
from jax.experimental import pallas as pl
from jax.experimental.pallas import tpu as pltpu


def _make_kernel(n_extra_layers, nonlin, skip_connection, a_scale):
    """Fused SimpleGMLP forward kernel. One grid step = one batch tile.

    Ref order: x, V, W1, b1, W2, b2, [Wi, bi] * n_extra_layers, out
    """

    def kernel(*refs):
        x_ref, v_ref, w1_ref, b1_ref, w2_ref, b2_ref = refs[:6]
        layer_refs = refs[6:6 + 2 * n_extra_layers]
        out_ref = refs[-1]

        # ---- TinyMLP l0 applied to V (a = l0(V)) ----
        # `a` depends only on V and the l0 weights (not on x). Recomputing it per
        # batch tile is a couple of sub-tile matmuls (essentially free) and avoids
        # any cross-grid-step scratch state, which keeps the "parallel" megacore
        # split trivially correct. V/W blocks have constant index_maps, so they
        # are not re-DMA'd between steps.
        v = v_ref[...]
        h1 = jnp.dot(v, w1_ref[...], preferred_element_type=jnp.float32) + b1_ref[...]
        h1 = jnp.maximum(h1, 0.0)                                   # ReLU
        a = jnp.dot(h1, w2_ref[...], preferred_element_type=jnp.float32) + b2_ref[...]
        if skip_connection:
            a = a + v

        # ---- nonlin on a (static choice, baked at trace time) ----
        if nonlin == "none":
            pass
        elif nonlin == "softmax":           # F.softmax(a, dim=0): over the node axis
            a = a - jnp.max(a, axis=0, keepdims=True)
            e = jnp.exp(a)
            a = e * pl.reciprocal(jnp.sum(e, axis=0, keepdims=True), approx=True)
        elif nonlin == "relu":
            a = jnp.maximum(a, 0.0)
        elif nonlin == "leakyrelu":
            a = jnp.where(a >= 0.0, a, 0.01 * a)
        elif nonlin == "tanh":
            a = jnp.tanh(a)
        else:
            raise ValueError(nonlin)

        # 1/div: folded into the first extra layer's weight host-side when extra
        # layers exist; otherwise fold it into `a` (N*m0 ops, not B*m0).
        if a_scale != 1.0:
            a = a * a_scale

        # ---- h = x @ a  (1/div already folded) ----
        h = jnp.dot(x_ref[...], a, preferred_element_type=jnp.float32)

        # ---- remaining Linear layers l1..l_{n-1} (ReLU between, none on last) ----
        for i in range(n_extra_layers):
            w = layer_refs[2 * i][...]
            b = layer_refs[2 * i + 1][...]
            h = jnp.dot(h, w, preferred_element_type=jnp.float32) + b
            if i != n_extra_layers - 1:
                h = jnp.maximum(h, 0.0)

        out_ref[...] = h.astype(out_ref.dtype)

    return kernel


def simple_gmlp_forward(x, V, params, *, nonlin="softmax", skip_connection=False,
                        div=1.0, tile_b=512):
    """params = (W1, b1, W2, b2, [(Wi, bi), ...])  with weights shaped (in, out)."""
    W1, b1, W2, b2, extra = params
    extra = list(extra)
    n_extra = len(extra)
    div = float(div)

    # ---- fold 1/div on the host (zero kernel cost) ----
    a_scale = 1.0
    if div != 1.0:
        if n_extra > 0:
            W_f, b_f = extra[0]
            extra[0] = (W_f * (1.0 / div), b_f)   # ((x@a)/div) @ W == (x@a) @ (W/div)
        else:
            a_scale = 1.0 / div

    B, N = x.shape
    node_dim = V.shape[1]
    hidden = W1.shape[1]
    m0 = W2.shape[1]
    out_dim = extra[-1][0].shape[1] if n_extra > 0 else m0

    # ---- batch tiling: stream x/out tiles, keep V/weights resident ----
    tb = int(min(B, tile_b))
    if tb < B:
        tb = max(8, (tb // 8) * 8)                # sublane alignment when actually tiling
    n_tiles = pl.cdiv(B, tb)
    B_pad = n_tiles * tb
    x_in = x if B_pad == B else jnp.pad(x, ((0, B_pad - B), (0, 0)))

    inputs = [x_in, V, W1, b1, W2, b2]
    for (Wi, bi) in extra:
        inputs.extend([Wi, bi])

    def _const_spec(arr):
        nd = arr.ndim
        return pl.BlockSpec(arr.shape, lambda i, _nd=nd: (0,) * _nd)

    in_specs = ([pl.BlockSpec((tb, N), lambda i: (i, 0))]
                + [_const_spec(a) for a in inputs[1:]])
    out_specs = pl.BlockSpec((tb, out_dim), lambda i: (i, 0))
    out_shape = jax.ShapeDtypeStruct((B_pad, out_dim), jnp.float32)

    # ---- advisory cost estimate (helps XLA schedule around this custom call) ----
    param_elems = sum(int(p.size) for p in inputs[2:])
    flops = 2 * B_pad * (N * m0 + sum(int(w.size) for (w, _) in extra))
    flops += 2 * n_tiles * (N * node_dim * hidden + N * hidden * m0)
    transcendentals = n_tiles * N * m0 if nonlin in ("softmax", "tanh") else 0
    bytes_accessed = 4 * (B_pad * N + B_pad * out_dim + int(V.size) + param_elems)
    cost = pl.CostEstimate(flops=int(flops), transcendentals=int(transcendentals),
                           bytes_accessed=int(bytes_accessed))

    # ---- VMEM budget: double-buffered streamed tiles + resident params + headroom.
    #      Clamped to 48 MiB so it stays under v7x's 64 MiB per-core VMEM. ----
    resident = 4 * (int(V.size) + param_elems)
    streamed = 4 * 2 * tb * (N + out_dim)
    scratchy = 4 * (N * hidden + N * m0
                    + tb * max([m0] + [w.shape[1] for (w, _) in extra]))
    vmem_limit = int(min(max(2 * (resident + streamed + scratchy), 4 << 20), 48 << 20))

    kernel = _make_kernel(n_extra, nonlin, skip_connection, a_scale)

    out = pl.pallas_call(
        kernel,
        out_shape=out_shape,
        grid=(n_tiles,),
        in_specs=in_specs,
        out_specs=out_specs,
        compiler_params=pltpu.CompilerParams(
            dimension_semantics=("parallel",),     # megacore-shard batch axis on v7x
            vmem_limit_bytes=vmem_limit),
        cost_estimate=cost,
    )(*inputs)

    return out[:B] if B_pad != B else out


def _linear_init(key, in_dim, out_dim):
    """PyTorch nn.Linear default init: U(-1/sqrt(in), 1/sqrt(in)). Weight stored (in, out)."""
    kw, kb = jax.random.split(key)
    bound = 1.0 / (in_dim ** 0.5)
    W = jax.random.uniform(kw, (in_dim, out_dim), jnp.float32, -bound, bound)
    b = jax.random.uniform(kb, (1, out_dim), jnp.float32, -bound, bound)
    return W, b


def _reference(x, V, params, nonlin, skip_connection, div):
    W1, b1, W2, b2, extra = params
    a = jnp.maximum(V @ W1 + b1, 0.0) @ W2 + b2
    if skip_connection:
        a = a + V
    if nonlin == "softmax":
        a = jax.nn.softmax(a, axis=0)
    elif nonlin == "relu":
        a = jnp.maximum(a, 0.0)
    elif nonlin == "leakyrelu":
        a = jnp.where(a >= 0.0, a, 0.01 * a)
    elif nonlin == "tanh":
        a = jnp.tanh(a)
    h = (x @ a) / div
    for i, (Wi, bi) in enumerate(extra):
        h = h @ Wi + bi
        if i != len(extra) - 1:
            h = jnp.maximum(h, 0.0)
    return h


if __name__ == "__main__":
    # Module config (small, consistent with SimpleGMLP.__init__):
    #   node_dim=8, m_layer_list=[32, 16, 8], enlarge=2, div=2.0,
    #   nonlin='softmax', skip_connection=False, use_bn=False, edge_index=None
    B = 4            # batch
    N = 16           # number of nodes (rows of V, columns of x)
    node_dim = 8
    m_layer_list = [32, 16, 8]
    enlarge = 2
    div = 2.0
    nonlin = "softmax"

    key = jax.random.PRNGKey(0)
    kx, kv, k1, k2, *klayers = jax.random.split(key, 3 + len(m_layer_list))

    x = jax.random.normal(kx, (B, N), jnp.float32)
    V = jax.random.normal(kv, (N, node_dim), jnp.float32)

    # TinyMLP l0: Linear(node_dim, m0*enlarge), Linear(m0*enlarge, m0)
    W1, b1 = _linear_init(k1, node_dim, m_layer_list[0] * enlarge)
    W2, b2 = _linear_init(k2, m_layer_list[0] * enlarge, m_layer_list[0])
    # l1..l_{n-1}: Linear(m_{i-1}, m_i)
    extra = []
    for i in range(1, len(m_layer_list)):
        Wi, bi = _linear_init(klayers[i - 1], m_layer_list[i - 1], m_layer_list[i])
        extra.append((Wi, bi))

    params = (W1, b1, W2, b2, extra)

    # -- reference-size run (single grid step) --
    out = simple_gmlp_forward(x, V, params, nonlin=nonlin, skip_connection=False, div=div)
    out = jax.block_until_ready(out)
    ref = _reference(x, V, params, nonlin, False, div)
    assert out.shape == (B, m_layer_list[-1]), out.shape
    # approx reciprocal in the softmax denominator -> slightly looser tolerance
    assert jnp.allclose(out, ref, atol=2e-3, rtol=2e-3), "mismatch vs reference (small B)"

    # -- exercise the batch grid (multi-tile + padding path) --
    B2 = 300
    x2 = jax.random.normal(jax.random.PRNGKey(1), (B2, N), jnp.float32)
    out2 = simple_gmlp_forward(x2, V, params, nonlin=nonlin, skip_connection=False,
                               div=div, tile_b=128)
    out2 = jax.block_until_ready(out2)
    ref2 = _reference(x2, V, params, nonlin, False, div)
    assert out2.shape == (B2, m_layer_list[-1]), out2.shape
    assert jnp.allclose(out2, ref2, atol=2e-3, rtol=2e-3), "mismatch vs reference (gridded B)"

    print("KERNEL_OK")
</pallas_src>

<mosaic_0001>
module attributes {stable_mosaic.version = 11 : i64} {
  func.func @kernel(%arg0: i32, %arg1: memref<4x16xf32, #tpu.memory_space<vmem>>, %arg2: memref<16x8xf32, #tpu.memory_space<vmem>>, %arg3: memref<8x64xf32, #tpu.memory_space<vmem>>, %arg4: memref<1x64xf32, #tpu.memory_space<vmem>>, %arg5: memref<64x32xf32, #tpu.memory_space<vmem>>, %arg6: memref<1x32xf32, #tpu.memory_space<vmem>>, %arg7: memref<32x16xf32, #tpu.memory_space<vmem>>, %arg8: memref<1x16xf32, #tpu.memory_space<vmem>>, %arg9: memref<16x8xf32, #tpu.memory_space<vmem>>, %arg10: memref<1x8xf32, #tpu.memory_space<vmem>>, %arg11: memref<4x8xf32, #tpu.memory_space<vmem>>) attributes {dimension_semantics = [#tpu.dimension_semantics<parallel>], iteration_bounds = array<i64: 1>, scalar_prefetch = 0 : i64, scratch_operands = 0 : i64, tpu.core_type = #tpu.core_type<tc>, window_params = [{transform_indices = @transform_0, window_bounds = array<i64: 4, 16>}, {pipeline_mode = #tpu.pipeline_mode<synchronous>, transform_indices = @transform_1, window_bounds = array<i64: 16, 8>}, {pipeline_mode = #tpu.pipeline_mode<synchronous>, transform_indices = @transform_2, window_bounds = array<i64: 8, 64>}, {pipeline_mode = #tpu.pipeline_mode<synchronous>, transform_indices = @transform_3, window_bounds = array<i64: 1, 64>}, {pipeline_mode = #tpu.pipeline_mode<synchronous>, transform_indices = @transform_4, window_bounds = array<i64: 64, 32>}, {pipeline_mode = #tpu.pipeline_mode<synchronous>, transform_indices = @transform_5, window_bounds = array<i64: 1, 32>}, {pipeline_mode = #tpu.pipeline_mode<synchronous>, transform_indices = @transform_6, window_bounds = array<i64: 32, 16>}, {pipeline_mode = #tpu.pipeline_mode<synchronous>, transform_indices = @transform_7, window_bounds = array<i64: 1, 16>}, {pipeline_mode = #tpu.pipeline_mode<synchronous>, transform_indices = @transform_8, window_bounds = array<i64: 16, 8>}, {pipeline_mode = #tpu.pipeline_mode<synchronous>, transform_indices = @transform_9, window_bounds = array<i64: 1, 8>}, {transform_indices = @transform_10, window_bounds = array<i64: 4, 8>}]} {
    %c0 = arith.constant 0 : index
    %c0_0 = arith.constant 0 : index
    %0 = vector.load %arg2[%c0, %c0_0] : memref<16x8xf32, #tpu.memory_space<vmem>>, vector<16x8xf32>
    %c0_1 = arith.constant 0 : index
    %c0_2 = arith.constant 0 : index
    %1 = vector.load %arg3[%c0_1, %c0_2] : memref<8x64xf32, #tpu.memory_space<vmem>>, vector<8x64xf32>
    %cst = arith.constant dense<0.000000e+00> : vector<16x64xf32>
    %2 = tpu.matmul %0, %1, %cst {dimension_numbers = #tpu.dot_dimension_numbers<[1], [0], [0], [1], [0, 0, 1, 1], [], []>} : vector<16x8xf32>, vector<8x64xf32>, vector<16x64xf32> -> vector<16x64xf32>
    %c0_3 = arith.constant 0 : index
    %c0_4 = arith.constant 0 : index
    %3 = vector.load %arg4[%c0_3, %c0_4] : memref<1x64xf32, #tpu.memory_space<vmem>>, vector<1x64xf32>
    %4 = vector.broadcast %3 : vector<1x64xf32> to vector<16x64xf32>
    %5 = arith.addf %2, %4 : vector<16x64xf32>
    %cst_5 = arith.constant 0.000000e+00 : f32
    %6 = vector.broadcast %cst_5 : f32 to vector<16x64xf32>
    %7 = arith.maximumf %5, %6 : vector<16x64xf32>
    %c0_6 = arith.constant 0 : index
    %c0_7 = arith.constant 0 : index
    %8 = vector.load %arg5[%c0_6, %c0_7] : memref<64x32xf32, #tpu.memory_space<vmem>>, vector<64x32xf32>
    %cst_8 = arith.constant dense<0.000000e+00> : vector<16x32xf32>
    %9 = tpu.matmul %7, %8, %cst_8 {dimension_numbers = #tpu.dot_dimension_numbers<[1], [0], [0], [1], [0, 0, 1, 1], [], []>} : vector<16x64xf32>, vector<64x32xf32>, vector<16x32xf32> -> vector<16x32xf32>
    %c0_9 = arith.constant 0 : index
    %c0_10 = arith.constant 0 : index
    %10 = vector.load %arg6[%c0_9, %c0_10] : memref<1x32xf32, #tpu.memory_space<vmem>>, vector<1x32xf32>
    %11 = vector.broadcast %10 : vector<1x32xf32> to vector<16x32xf32>
    %12 = arith.addf %9, %11 : vector<16x32xf32>
    %cst_11 = arith.constant dense<0xFF800000> : vector<32xf32>
    %13 = vector.multi_reduction <maximumf>, %12, %cst_11 [0] : vector<16x32xf32> to vector<32xf32>
    %14 = vector.shape_cast %13 : vector<32xf32> to vector<1x32xf32>
    %15 = vector.broadcast %14 : vector<1x32xf32> to vector<16x32xf32>
    %16 = arith.subf %12, %15 : vector<16x32xf32>
    %17 = math.exp %16 : vector<16x32xf32>
    %cst_12 = arith.constant dense<0.000000e+00> : vector<32xf32>
    %18 = vector.multi_reduction <add>, %17, %cst_12 [0] : vector<16x32xf32> to vector<32xf32>
    %19 = vector.shape_cast %18 : vector<32xf32> to vector<1x32xf32>
    %20 = tpu.reciprocal %19 {approx = true} : vector<1x32xf32> -> vector<1x32xf32>
    %21 = vector.broadcast %20 : vector<1x32xf32> to vector<16x32xf32>
    %22 = arith.mulf %17, %21 : vector<16x32xf32>
    %c0_13 = arith.constant 0 : index
    %c0_14 = arith.constant 0 : index
    %23 = vector.load %arg1[%c0_13, %c0_14] : memref<4x16xf32, #tpu.memory_space<vmem>>, vector<4x16xf32>
    %cst_15 = arith.constant dense<0.000000e+00> : vector<4x32xf32>
    %24 = tpu.matmul %23, %22, %cst_15 {dimension_numbers = #tpu.dot_dimension_numbers<[1], [0], [0], [1], [0, 0, 1, 1], [], []>} : vector<4x16xf32>, vector<16x32xf32>, vector<4x32xf32> -> vector<4x32xf32>
    %c0_16 = arith.constant 0 : index
    %c0_17 = arith.constant 0 : index
    %25 = vector.load %arg7[%c0_16, %c0_17] : memref<32x16xf32, #tpu.memory_space<vmem>>, vector<32x16xf32>
    %c0_18 = arith.constant 0 : index
    %c0_19 = arith.constant 0 : index
    %26 = vector.load %arg8[%c0_18, %c0_19] : memref<1x16xf32, #tpu.memory_space<vmem>>, vector<1x16xf32>
    %cst_20 = arith.constant dense<0.000000e+00> : vector<4x16xf32>
    %27 = tpu.matmul %24, %25, %cst_20 {dimension_numbers = #tpu.dot_dimension_numbers<[1], [0], [0], [1], [0, 0, 1, 1], [], []>} : vector<4x32xf32>, vector<32x16xf32>, vector<4x16xf32> -> vector<4x16xf32>
    %28 = vector.broadcast %26 : vector<1x16xf32> to vector<4x16xf32>
    %29 = arith.addf %27, %28 : vector<4x16xf32>
    %cst_21 = arith.constant 0.000000e+00 : f32
    %30 = vector.broadcast %cst_21 : f32 to vector<4x16xf32>
    %31 = arith.maximumf %29, %30 : vector<4x16xf32>
    %c0_22 = arith.constant 0 : index
    %c0_23 = arith.constant 0 : index
    %32 = vector.load %arg9[%c0_22, %c0_23] : memref<16x8xf32, #tpu.memory_space<vmem>>, vector<16x8xf32>
    %c0_24 = arith.constant 0 : index
    %c0_25 = arith.constant 0 : index
    %33 = vector.load %arg10[%c0_24, %c0_25] : memref<1x8xf32, #tpu.memory_space<vmem>>, vector<1x8xf32>
    %cst_26 = arith.constant dense<0.000000e+00> : vector<4x8xf32>
    %34 = tpu.matmul %31, %32, %cst_26 {dimension_numbers = #tpu.dot_dimension_numbers<[1], [0], [0], [1], [0, 0, 1, 1], [], []>} : vector<4x16xf32>, vector<16x8xf32>, vector<4x8xf32> -> vector<4x8xf32>
    %35 = vector.broadcast %33 : vector<1x8xf32> to vector<4x8xf32>
    %36 = arith.addf %34, %35 : vector<4x8xf32>
    %c0_27 = arith.constant 0 : index
    %c0_28 = arith.constant 0 : index
    %37 = vector.load %arg11[%c0_27, %c0_28] : memref<4x8xf32, #tpu.memory_space<vmem>>, vector<4x8xf32>
    tpu.vector_store %arg11[%c0_27, %c0_28], %36 {strides = array<i32>} : memref<4x8xf32, #tpu.memory_space<vmem>>, vector<4x8xf32>,
    return
  }
  func.func @transform_0(%arg0: i32) -> (i32, i32) {
    %c0_i32 = arith.constant 0 : i32
    %c0_i32_0 = arith.constant 0 : i32
    return %arg0, %c0_i32 : i32, i32
  }
  func.func @transform_1(%arg0: i32) -> (i32, i32) {
    %c0_i32 = arith.constant 0 : i32
    %c0_i32_0 = arith.constant 0 : i32
    %c0_i32_1 = arith.constant 0 : i32
    return %c0_i32, %c0_i32_0 : i32, i32
  }
  func.func @transform_2(%arg0: i32) -> (i32, i32) {
    %c0_i32 = arith.constant 0 : i32
    %c0_i32_0 = arith.constant 0 : i32
    %c0_i32_1 = arith.constant 0 : i32
    return %c0_i32, %c0_i32_0 : i32, i32
  }
  func.func @transform_3(%arg0: i32) -> (i32, i32) {
    %c0_i32 = arith.constant 0 : i32
    %c0_i32_0 = arith.constant 0 : i32
    %c0_i32_1 = arith.constant 0 : i32
    return %c0_i32, %c0_i32_0 : i32, i32
  }
  func.func @transform_4(%arg0: i32) -> (i32, i32) {
    %c0_i32 = arith.constant 0 : i32
    %c0_i32_0 = arith.constant 0 : i32
    %c0_i32_1 = arith.constant 0 : i32
    return %c0_i32, %c0_i32_0 : i32, i32
  }
  func.func @transform_5(%arg0: i32) -> (i32, i32) {
    %c0_i32 = arith.constant 0 : i32
    %c0_i32_0 = arith.constant 0 : i32
    %c0_i32_1 = arith.constant 0 : i32
    return %c0_i32, %c0_i32_0 : i32, i32
  }
  func.func @transform_6(%arg0: i32) -> (i32, i32) {
    %c0_i32 = arith.constant 0 : i32
    %c0_i32_0 = arith.constant 0 : i32
    %c0_i32_1 = arith.constant 0 : i32
    return %c0_i32, %c0_i32_0 : i32, i32
  }
  func.func @transform_7(%arg0: i32) -> (i32, i32) {
    %c0_i32 = arith.constant 0 : i32
    %c0_i32_0 = arith.constant 0 : i32
    %c0_i32_1 = arith.constant 0 : i32
    return %c0_i32, %c0_i32_0 : i32, i32
  }
  func.func @transform_8(%arg0: i32) -> (i32, i32) {
    %c0_i32 = arith.constant 0 : i32
    %c0_i32_0 = arith.constant 0 : i32
    %c0_i32_1 = arith.constant 0 : i32
    return %c0_i32, %c0_i32_0 : i32, i32
  }
  func.func @transform_9(%arg0: i32) -> (i32, i32) {
    %c0_i32 = arith.constant 0 : i32
    %c0_i32_0 = arith.constant 0 : i32
    %c0_i32_1 = arith.constant 0 : i32
    return %c0_i32, %c0_i32_0 : i32, i32
  }
  func.func @transform_10(%arg0: i32) -> (i32, i32) {
    %c0_i32 = arith.constant 0 : i32
    %c0_i32_0 = arith.constant 0 : i32
    return %arg0, %c0_i32 : i32, i32
  }
}

</mosaic_0001>

<bundles_post_ra>
// kernel: tpu_custom_call.1
= control target key start
LH: loop header
LB: loop body
LE: loop exit
PB: predicated region body
PF: predicated region fallthrough
CT: control target
= control target key end

     0   :  { %vm46_vm0 = vcmask 64512   ;;  %s776_s0 = inlined_call_operand.vmem [shape: f32[4,16], index: 0, kind: input, shape index: {}]   ;;  %s777_s1 = inlined_call_operand.vmem [shape: f32[16,8], index: 1, kind: input, shape index: {}]   ;;  %s778_s2 = inlined_call_operand.vmem [shape: f32[8,64], index: 2, kind: input, shape index: {}]   ;;  %s779_s3 = inlined_call_operand.vmem [shape: f32[1,64], index: 3, kind: input, shape index: {}]   ;;  %s780_s4 = inlined_call_operand.vmem [shape: f32[64,32], index: 4, kind: input, shape index: {}]   ;;  %s781_s5 = inlined_call_operand.vmem [shape: f32[1,32], index: 5, kind: input, shape index: {}]   ;;  %s782_s6 = inlined_call_operand.vmem [shape: f32[32,16], index: 6, kind: input, shape index: {}]   ;;  %s783_s7 = inlined_call_operand.vmem [shape: f32[1,16], index: 7, kind: input, shape index: {}]   ;;  %s784_s8 = inlined_call_operand.vmem [shape: f32[16,8], index: 8, kind: input, shape index: {}]   ;;  %s785_s9 = inlined_call_operand.vmem [shape: f32[1,8], index: 9, kind: input, shape index: {}]   ;;  %s786_s10 = inlined_call_operand.hbm [shape: f32[4,8], index: 10, kind: output, shape index: {}]  }
   0x1   :  { %v38_v0 = vld [vmem:[%s778_s2] sm:$0xff]  ;;  %v37_v2 = vld [vmem:[%s777_s1 + $0x8] sm:$0xff]  ;;  %v137_v3 = vld [vmem:[%s780_s4 + $0x38] sm:$0xff] }
   0x2   :  { %v36_v1 = vld [vmem:[%s777_s1] sm:$0xff]  ;;  %548 = vmatprep.subr.mxu0 %v38_v0  ;;  %v136_v4 = vld [vmem:[%s780_s4 + $0x30] sm:$0xff]  ;;  %553 = vmatprep.subr.mxu1 %v137_v3 }
   0x3   :  { %550 = vmatprep.mubr.msk.f32.mxu0 %vm46_vm0, %v36_v1  ;;  %549 = vmatpush3.msra.mxu0 %v38_v0 }
   0x4   :  { %15 = vsyncpa [#allocation3], 0  ;;  %551 = vmatmul.mubr.msk.f32.vlgmr.msra.gmra.mxu0 %vm46_vm0, %v37_v2  ;;  %554 = vmatpush3.msra.mxu1 %v137_v3  ;;  %v135_v5 = vld [vmem:[%s780_s4 + $0x28] sm:$0xff]  ;;  %v134_v6 = vld [vmem:[%s780_s4 + $0x20] sm:$0xff]  ;;  %vm145_vm1 = vcmask 523264   ;;  %v628_v18 = vmov 0.0  }
   0x5   :  { %555 = vmatprep.subr.mxu1 %v136_v4  ;;  %v133_v7 = vld [vmem:[%s780_s4 + $0x18] sm:$0xff]  ;;  %v132_v8 = vld [vmem:[%s780_s4 + $0x10] sm:$0xff]  ;;  %v131_v9 = vld [vmem:[%s780_s4 + $0x8] sm:$0xff]  ;;  %572 = vmatprep.subr.mxu0 %v628_v18  ;;  %vm629_vm2 = vmmov 0   ;;  %vm227_vm3 = vcmask 261120   ;;  %vm256_vm4 = vcmask 130048  }
   0x6   :  { %556 = vmatpush3.msra.mxu1 %v136_v4  ;;  %v130_v10 = vld [vmem:[%s780_s4] sm:$0xff]  ;;  %576 = vmatprep.mubr.msk.f32.mxu0 %vm629_vm2, %v628_v18  ;;  %v333_v52 = vld [vmem:[%s782_s6 + $0x18] sm:$0xff]  ;;  %v332_v53 = vld [vmem:[%s782_s6 + $0x10] sm:$0xff]  ;;  %s630_s28 = smov [#allocation2]   ;;  %vm497_vm5 = vcmask 60416  }
   0x7   :  { %557 = vmatprep.subr.mxu1 %v135_v5  ;;  %v513_v11 = vld [vmem:[%s779_s3] ss:$0 sm:$0xff]  ;;  %v331_v54 = vld [vmem:[%s782_s6 + $0x8] sm:$0xff]  ;;  %s505_s29 = sshll.u32 %s630_s28, 4  ;;  %s506_s29 = int_to_ptr.vmem [resolvable:$true] %s505_s29 }
   0x8   :  { %558 = vmatpush3.msra.mxu1 %v135_v5  ;;  %v516_v19 = vld [vmem:[%s781_s5] ss:$0 sm:$0xff]  ;;  %v416_v58 = vld [vmem:[%s784_s8 + $0x8] sm:$0xff]  ;;  %p611_p1 = scmp.lt.s32.totalorder %s506_s29, %s506_s29 }
   0x9   :  { %559 = vmatprep.subr.mxu1 %v134_v6  ;;  %v255_v51 = vld [vmem:[%s776_s0] sm:$0xf] }
   0xa   :  { %560 = vmatpush3.msra.mxu1 %v134_v6  ;;  %v330_v55 = vld [vmem:[%s782_s6] sm:$0xff] }
   0xb   :  { %561 = vmatprep.subr.mxu1 %v133_v7  ;;  %v415_v59 = vld [vmem:[%s784_s8] sm:$0xff]  ;;  %s606_s8 = scalar_lea.vmem %s506_s29, 64 }
   0xc   :  { %562 = vmatpush3.msra.mxu1 %v133_v7  ;;  %v520_v60 = vld [vmem:[%s783_s7] ss:$0 sm:$0xff]  ;;  %p607_p0 = scmp.ne.s32.totalorder %s506_s29, %s606_s8  ;;  %p612_p2 = scmp.lt.s32.totalorder %s606_s8, %s606_s8 }
   0xd   :  { %563 = vmatprep.subr.mxu1 %v132_v8  ;;  %v522_v1 = vld [vmem:[%s785_s9] ss:$0 sm:$0xff] }
   0xe   :  { %564 = vmatpush3.msra.mxu1 %v132_v8  ;;  %p613_p3 = por %p612_p2, %p611_p1 }
   0xf   :  { %565 = vmatprep.subr.mxu1 %v131_v9 }
  0x10   :  { %566 = vmatpush3.msra.mxu1 %v131_v9  ;;  %p614_p4 = pnand %p613_p3, %p607_p0 }
  0x11   :  { %567 = vmatprep.subr.mxu1 %v130_v10 }
  0x12   :  { %568 = vmatpush3.msra.mxu1 %v130_v10 }
  0xc4   :  { %v552_v12 = vpop.f32.mrf.mxu0 }
  0xc5   :  { %v125_v13 = vadd.f32 %v552_v12, %v513_v11 }
  0xc6   :  { %v119_v14 = vpop.f32.mrf.mxu0 }
  0xc7   :  { %v120_v15 = vadd.f32 %v513_v11, %v119_v14  ;;  %v129_v17 = vmax.f32 %v125_v13, 0.0 }
  0xc9   :  { %v128_v16 = vmax.f32 %v120_v15, 0.0 }
  0xcb   :  { %569 = vmatprep.mubr.msk.f32.mxu1 %vm145_vm1, %v128_v16 }
  0xcc   :  { %570 = vmatmul.mubr.msk.f32.vlgmr.msra.gmra.mxu1 %vm145_vm1, %v129_v17 }
 0x18c   :  { %v571_v20 = vpop.f32.mrf.mxu1 }
 0x18d   :  { %v224_v21 = vadd.f32 %v571_v20, %v516_v19 }
 0x18e   :  { %v218_v22 = vpop.f32.mrf.mxu1 }
 0x18f   :  { %v219_v23 = vadd.f32 %v516_v19, %v218_v22  ;;  %v229_v24 = vsel %vm227_vm3, %v224_v21, -inf }
 0x191   :  { %v228_v25 = vsel %vm227_vm3, %v219_v23, -inf }
 0x192   :  { %v230_v26 = vmax.f32 %v228_v25, %v229_v24 }
 0x194   :  { %v231_v27 = vrot.slane %v230_v26, 4 }
 0x196   :  { %v232_v28 = vmax.f32 %v230_v26, %v231_v27 }
 0x198   :  { %v233_v29 = vrot.slane %v232_v28, 2 }
 0x19a   :  { %v234_v30 = vmax.f32 %v232_v28, %v233_v29 }
 0x19c   :  { %v235_v31 = vrot.slane %v234_v30, 1 }
 0x19e   :  { %v236_v32 = vmax.f32 %v234_v30, %v235_v31 }
 0x1a0   :  { %v237_v33 = vsub.f32 %v219_v23, %v236_v32  ;;  %v238_v34 = vsub.f32 %v224_v21, %v236_v32 }
 0x1a2   :  { %v239_v35 = vmul.f32 1.442695, %v237_v33  ;;  %v241_v36 = vmul.f32 1.442695, %v238_v34 }
 0x1a4   :  { %600 = vpow2.f32 %v239_v35 }
 0x1a5   :  { %602 = vpow2.f32 %v241_v36 }
 0x1b1   :  { %v601_v37 = vpop.eup %600 }
 0x1b2   :  { %v603_v38 = vpop.eup %602  ;;  %v243_v39 = vsel %vm227_vm3, %v601_v37, 0.0 }
 0x1b3   :  { %v244_v40 = vsel %vm227_vm3, %v603_v38, 0.0 }
 0x1b4   :  { %v245_v41 = vadd.f32 %v244_v40, %v243_v39 }
 0x1b6   :  { %v246_v42 = vrot.slane %v245_v41, 4 }
 0x1b8   :  { %v247_v43 = vadd.f32 %v246_v42, %v245_v41 }
 0x1ba   :  { %v248_v44 = vrot.slane %v247_v43, 2 }
 0x1bc   :  { %v249_v45 = vadd.f32 %v248_v44, %v247_v43 }
 0x1be   :  { %v250_v46 = vrot.slane %v249_v45, 1 }
 0x1c0   :  { %v251_v47 = vadd.f32 %v250_v46, %v249_v45 }
 0x1c2   :  { %604 = vrcp.f32 %v251_v47 }
 0x1cf   :  { %v605_v48 = vpop.eup %604 }
 0x1d0   :  { %v254_v49 = vmul.f32 %v605_v48, %v603_v38  ;;  %v253_v50 = vmul.f32 %v605_v48, %v601_v37 }
 0x1d2   :  { %573 = vmatpush3.msra.mxu0 %v254_v49 }
 0x1d3   :  { %574 = vmatprep.subr.mxu0 %v628_v18 }
 0x1d4   :  { %575 = vmatpush3.msra.mxu0 %v253_v50 }
 0x1d5   :  { %577 = vmatmul.mubr.msk.f32.vlgmr.msra.gmra.mxu0 %vm256_vm4, %v255_v51  ;;  %579 = vmatprep.subr.mxu0 %v628_v18 }
 0x1d6   :  { %580 = vmatpush3.msra.mxu0 %v333_v52  ;;  %587 = vmatprep.mubr.msk.f32.mxu0 %vm629_vm2, %v628_v18 }
 0x1d7   :  { %581 = vmatprep.subr.mxu0 %v628_v18 }
 0x1d8   :  { %582 = vmatpush3.msra.mxu0 %v332_v53 }
 0x1d9   :  { %583 = vmatprep.subr.mxu0 %v628_v18 }
 0x1da   :  { %584 = vmatpush3.msra.mxu0 %v331_v54 }
 0x1db   :  { %585 = vmatprep.subr.mxu0 %v628_v18 }
 0x1dc   :  { %586 = vmatpush3.msra.mxu0 %v330_v55 }
 0x1dd   :  { %590 = vmatprep.subr.mxu0 %v628_v18 }
 0x295   :  { %v326_v56 = vpop.f32.mrf.mxu0 }
 0x296   :  { %588 = vmatmul.mubr.msk.f32.vlgmr.msra.gmra.mxu0 %vm227_vm3, %v326_v56 }
 0x297   :  { %v578_v57 = vpop.f32.mrf.mxu0  ;;  %594 = vmatprep.mubr.msk.f32.mxu0 %vm629_vm2, %v628_v18  ;;  %591 = vmatpush3.msra.mxu0 %v416_v58 }
 0x298   :  { %592 = vmatprep.subr.mxu0 %v628_v18 }
 0x299   :  { %593 = vmatpush3.msra.mxu0 %v415_v59 }
 0x356   :  { %v410_v61 = vpop.f32.mrf.mxu0 }
 0x357   :  { %v411_v62 = vadd.f32 %v520_v60, %v410_v61 }
 0x358   :  { %v589_v63 = vpop.f32.mrf.mxu0 }
 0x359   :  { %v414_v0 = vmax.f32 %v411_v62, 0.0 }
 0x35b   :  { %595 = vmatmul.mubr.msk.f32.vlgmr.msra.gmra.mxu0 %vm256_vm4, %v414_v0 }
 0x41b   :  { %v493_v2 = vpop.f32.mrf.mxu0 }
 0x41c   :  { %v494_v3 = vadd.f32 %v522_v1, %v493_v2 }
 0x41d   :  { %v596_v4 = vpop.f32.mrf.mxu0 }
 0x41e   :  { %498 = vst.msk [vmem:[#allocation2] sm:$0xf] %vm497_vm5, %v494_v3 }
 0x41f   :  { %617 = shalt.err (!%p614_p4)
}
 0x420   :  { %508 = dma.vmem_to_hbm [thread:$0]  %s506_s29, 64, %s786_s10, [#allocation3]  }
 0x421   :  { %626 = dma.done.wait [#allocation3], 64  }
 0x422   :  { %627 = vsyncadd [#allocation3], 4294967232 }
 0x423   :  { %512 = vsyncpa [#allocation3], 1 }

</bundles_post_ra>
